<compile_context>
chip_gen: v6e
topology: v6e:2x2x1
jax: 0.10.0
libtpu: 0.0.40
codegen_flags: <defaults>
</compile_context>

<pallas_src>
import math

import jax
import jax.numpy as jnp
from jax.experimental import pallas as pl
from jax.experimental.pallas import tpu as pltpu

_LANE = 128
_SUBLANE = 8


def _qnet_kernel(s_ref, a_ref, w1_ref, b1_ref, w2_ref, b2_ref, out_ref):
    """Fused 2-layer MLP, MXU-free (VPU broadcast MAC + XLU lane reduce)."""
    s = s_ref[...]                                   # (Bt, 1) f32
    a = a_ref[...]                                   # (Bt, 1) f32
    w1_s = w1_ref[0:1, :]                            # (1, F) weights for state
    w1_a = w1_ref[1:2, :]                            # (1, F) weights for action
    # Layer 1: broadcast multiply-add on the VPU, then ReLU.
    h = jnp.maximum(s * w1_s + a * w1_a + b1_ref[...], 0.0)     # (Bt, F)
    # Layer 2: elementwise multiply + cross-lane sum (XLU), bias from SMEM.
    y = jnp.sum(h * w2_ref[...], axis=-1, keepdims=True)        # (Bt, 1)
    out_ref[...] = (y + b2_ref[0]).astype(out_ref.dtype)


def init_params(seed: int = 0, fc1_unit: int = 2000):
    """Deterministic init matching nn.Linear's U(-1/sqrt(fan_in), 1/sqrt(fan_in)).

    Weights are stored [in_features, out_features] (transpose of PyTorch)."""
    key = jax.random.PRNGKey(seed)
    k1, k2, k3, k4 = jax.random.split(key, 4)
    bound1 = 1.0 / math.sqrt(2.0)
    bound2 = 1.0 / math.sqrt(float(fc1_unit))
    return {
        "w1": jax.random.uniform(k1, (2, fc1_unit), jnp.float32, -bound1, bound1),
        "b1": jax.random.uniform(k2, (fc1_unit,), jnp.float32, -bound1, bound1),
        "w2": jax.random.uniform(k3, (fc1_unit, 1), jnp.float32, -bound2, bound2),
        "b2": jax.random.uniform(k4, (1,), jnp.float32, -bound2, bound2),
    }


def prepare_kernel_params(params):
    """Pad fc1 to a multiple of 128 lanes and lay weights out for the kernel.

    Padded W2 rows are zero, so padded hidden lanes contribute nothing and the
    result is bit-for-bit a function of the original 2000 units."""
    w1, b1, w2, b2 = params["w1"], params["b1"], params["w2"], params["b2"]
    f = w1.shape[1]
    f_pad = _LANE * int(pl.cdiv(f, _LANE))
    pad = f_pad - f
    w1p = jnp.pad(w1.astype(jnp.float32), ((0, 0), (0, pad)))            # (2, F_pad)
    b1p = jnp.pad(b1.astype(jnp.float32), (0, pad)).reshape(1, f_pad)    # (1, F_pad)
    w2p = jnp.pad(w2.astype(jnp.float32).reshape(1, f), ((0, 0), (0, pad)))  # (1, F_pad)
    b2p = b2.astype(jnp.float32).reshape(1)                              # (1,)
    return {"w1": w1p, "b1": b1p, "w2": w2p, "b2": b2p}


def qnetwork_forward(state_batch, action_batch, kparams):
    """Run the fused Pallas MLP on (B,)- or (B,1)-shaped state/action batches."""
    w1, b1, w2, b2 = kparams["w1"], kparams["b1"], kparams["w2"], kparams["b2"]
    f_pad = w1.shape[1]

    s = jnp.asarray(state_batch, jnp.float32).reshape(-1, 1)   # (B, 1)
    a = jnp.asarray(action_batch, jnp.float32).reshape(-1, 1)  # (B, 1)
    B = s.shape[0]

    # Batch tile: multiple of 8 sublanes; cap at 256 so the (Bt, F_pad) f32
    # hidden activation stays small enough to avoid vreg spills, letting the
    # grid pipeline input/output DMA under compute for large batches.
    bt = min(256, _SUBLANE * int(pl.cdiv(B, _SUBLANE)))
    b_pad = bt * int(pl.cdiv(B, bt))
    if b_pad != B:
        s = jnp.pad(s, ((0, b_pad - B), (0, 0)))
        a = jnp.pad(a, ((0, b_pad - B), (0, 0)))

    batch_spec = pl.BlockSpec((bt, 1), lambda i: (i, 0))
    resident = lambda shape: pl.BlockSpec(shape, lambda i: (0, 0))  # weights stay put

    out = pl.pallas_call(
        _qnet_kernel,
        out_shape=jax.ShapeDtypeStruct((b_pad, 1), jnp.float32),
        grid=(b_pad // bt,),
        in_specs=[
            batch_spec,                      # state column  (Bt, 1)
            batch_spec,                      # action column (Bt, 1)
            resident((2, f_pad)),            # W1 rows: [state_w, action_w]
            resident((1, f_pad)),            # b1
            resident((1, f_pad)),            # W2 as a lane-dense row vector
            pl.BlockSpec(memory_space=pltpu.MemorySpace.SMEM),  # b2 scalar
        ],
        out_specs=batch_spec,
        compiler_params=pltpu.CompilerParams(
            # Batch tiles are independent -> shard across TCs on v7x megacore.
            dimension_semantics=("parallel",),
        ),
    )(s, a, w1, b1, w2, b2)
    return out[:B]


if __name__ == "__main__":
    B = 8
    fc1_unit = 2000

    params = init_params(seed=0, fc1_unit=fc1_unit)
    kparams = prepare_kernel_params(params)

    key = jax.random.PRNGKey(0)
    ks, ka = jax.random.split(key)
    state_batch = jax.random.normal(ks, (B,), jnp.float32)
    action_batch = jax.random.randint(ka, (B,), 0, 4).astype(jnp.float32)

    actions = qnetwork_forward(state_batch, action_batch, kparams)
    actions = jax.block_until_ready(actions)

    # Pure-JAX reference with the unpadded weights: relu(x @ W1 + b1) @ W2 + b2
    x_ref = jnp.stack([state_batch, action_batch], axis=1)               # (B, 2)
    h_ref = jnp.maximum(x_ref @ params["w1"] + params["b1"], 0.0)
    y_ref = h_ref @ params["w2"] + params["b2"]

    assert actions.shape == (B, 1)
    assert jnp.allclose(actions, y_ref, atol=1e-4, rtol=1e-4)

    print("KERNEL_OK")
</pallas_src>

<mosaic_0001>
module attributes {stable_mosaic.version = 11 : i64} {
  func.func @_qnet_kernel(%arg0: i32, %arg1: memref<8x1xf32, #tpu.memory_space<vmem>>, %arg2: memref<8x1xf32, #tpu.memory_space<vmem>>, %arg3: memref<2x2048xf32, #tpu.memory_space<vmem>>, %arg4: memref<1x2048xf32, #tpu.memory_space<vmem>>, %arg5: memref<1x2048xf32, #tpu.memory_space<vmem>>, %arg6: memref<1xf32, #tpu.memory_space<smem>>, %arg7: memref<8x1xf32, #tpu.memory_space<vmem>>) attributes {dimension_semantics = [#tpu.dimension_semantics<parallel>], iteration_bounds = array<i64: 1>, scalar_prefetch = 0 : i64, scratch_operands = 0 : i64, tpu.core_type = #tpu.core_type<tc>, window_params = [{transform_indices = @transform_0, window_bounds = array<i64: 8, 1>}, {transform_indices = @transform_1, window_bounds = array<i64: 8, 1>}, {pipeline_mode = #tpu.pipeline_mode<synchronous>, transform_indices = @transform_2, window_bounds = array<i64: 2, 2048>}, {pipeline_mode = #tpu.pipeline_mode<synchronous>, transform_indices = @transform_3, window_bounds = array<i64: 1, 2048>}, {pipeline_mode = #tpu.pipeline_mode<synchronous>, transform_indices = @transform_4, window_bounds = array<i64: 1, 2048>}, {transform_indices = @transform_5, window_bounds = array<i64: 1>}, {transform_indices = @transform_6, window_bounds = array<i64: 8, 1>}]} {
    %c0 = arith.constant 0 : index
    %c0_0 = arith.constant 0 : index
    %0 = vector.load %arg1[%c0, %c0_0] : memref<8x1xf32, #tpu.memory_space<vmem>>, vector<8x1xf32>
    %c0_1 = arith.constant 0 : index
    %c0_2 = arith.constant 0 : index
    %1 = vector.load %arg2[%c0_1, %c0_2] : memref<8x1xf32, #tpu.memory_space<vmem>>, vector<8x1xf32>
    %c0_3 = arith.constant 0 : index
    %c0_4 = arith.constant 0 : index
    %2 = vector.load %arg3[%c0_3, %c0_4] : memref<2x2048xf32, #tpu.memory_space<vmem>>, vector<1x2048xf32>
    %c1 = arith.constant 1 : index
    %c0_5 = arith.constant 0 : index
    %3 = vector.load %arg3[%c1, %c0_5] : memref<2x2048xf32, #tpu.memory_space<vmem>>, vector<1x2048xf32>
    %4 = vector.broadcast %0 : vector<8x1xf32> to vector<8x2048xf32>
    %5 = vector.broadcast %2 : vector<1x2048xf32> to vector<8x2048xf32>
    %6 = arith.mulf %4, %5 : vector<8x2048xf32>
    %7 = vector.broadcast %1 : vector<8x1xf32> to vector<8x2048xf32>
    %8 = vector.broadcast %3 : vector<1x2048xf32> to vector<8x2048xf32>
    %9 = arith.mulf %7, %8 : vector<8x2048xf32>
    %10 = arith.addf %6, %9 : vector<8x2048xf32>
    %c0_6 = arith.constant 0 : index
    %c0_7 = arith.constant 0 : index
    %11 = vector.load %arg4[%c0_6, %c0_7] : memref<1x2048xf32, #tpu.memory_space<vmem>>, vector<1x2048xf32>
    %12 = vector.broadcast %11 : vector<1x2048xf32> to vector<8x2048xf32>
    %13 = arith.addf %10, %12 : vector<8x2048xf32>
    %cst = arith.constant 0.000000e+00 : f32
    %14 = vector.broadcast %cst : f32 to vector<8x2048xf32>
    %15 = arith.maximumf %13, %14 : vector<8x2048xf32>
    %c0_8 = arith.constant 0 : index
    %c0_9 = arith.constant 0 : index
    %16 = vector.load %arg5[%c0_8, %c0_9] : memref<1x2048xf32, #tpu.memory_space<vmem>>, vector<1x2048xf32>
    %17 = vector.broadcast %16 : vector<1x2048xf32> to vector<8x2048xf32>
    %18 = arith.mulf %15, %17 : vector<8x2048xf32>
    %cst_10 = arith.constant dense<0.000000e+00> : vector<8xf32>
    %19 = vector.multi_reduction <add>, %18, %cst_10 [1] : vector<8x2048xf32> to vector<8xf32>
    %20 = vector.shape_cast %19 : vector<8xf32> to vector<8x1xf32>
    %c0_11 = arith.constant 0 : index
    %21 = memref.load %arg6[%c0_11] : memref<1xf32, #tpu.memory_space<smem>>
    %22 = vector.broadcast %21 : f32 to vector<8x1xf32>
    %23 = arith.addf %20, %22 : vector<8x1xf32>
    %c0_12 = arith.constant 0 : index
    %c0_13 = arith.constant 0 : index
    %24 = vector.load %arg7[%c0_12, %c0_13] : memref<8x1xf32, #tpu.memory_space<vmem>>, vector<8x1xf32>
    tpu.vector_store %arg7[%c0_12, %c0_13], %23 {strides = array<i32>} : memref<8x1xf32, #tpu.memory_space<vmem>>, vector<8x1xf32>,
    return
  }
  func.func @transform_0(%arg0: i32) -> (i32, i32) {
    %c0_i32 = arith.constant 0 : i32
    %c0_i32_0 = arith.constant 0 : i32
    return %arg0, %c0_i32 : i32, i32
  }
  func.func @transform_1(%arg0: i32) -> (i32, i32) {
    %c0_i32 = arith.constant 0 : i32
    %c0_i32_0 = arith.constant 0 : i32
    return %arg0, %c0_i32 : i32, i32
  }
  func.func @transform_2(%arg0: i32) -> (i32, i32) {
    %c0_i32 = arith.constant 0 : i32
    %c0_i32_0 = arith.constant 0 : i32
    %c0_i32_1 = arith.constant 0 : i32
    return %c0_i32, %c0_i32_0 : i32, i32
  }
  func.func @transform_3(%arg0: i32) -> (i32, i32) {
    %c0_i32 = arith.constant 0 : i32
    %c0_i32_0 = arith.constant 0 : i32
    %c0_i32_1 = arith.constant 0 : i32
    return %c0_i32, %c0_i32_0 : i32, i32
  }
  func.func @transform_4(%arg0: i32) -> (i32, i32) {
    %c0_i32 = arith.constant 0 : i32
    %c0_i32_0 = arith.constant 0 : i32
    %c0_i32_1 = arith.constant 0 : i32
    return %c0_i32, %c0_i32_0 : i32, i32
  }
  func.func @transform_5(%arg0: i32) -> i32 {
    %c0_i32 = arith.constant 0 : i32
    %c0_i32_0 = arith.constant 0 : i32
    return %c0_i32 : i32
  }
  func.func @transform_6(%arg0: i32) -> (i32, i32) {
    %c0_i32 = arith.constant 0 : i32
    %c0_i32_0 = arith.constant 0 : i32
    return %arg0, %c0_i32 : i32, i32
  }
}

</mosaic_0001>

<bundles_post_ra>
// kernel: tpu_custom_call.1
= control target key start
LH: loop header
LB: loop body
LE: loop exit
PB: predicated region body
PF: predicated region fallthrough
CT: control target
= control target key end

     0   :  { %12 = vsyncpa [#allocation4], 0  ;;  %s877_s0 = inlined_call_operand.vmem [shape: f32[8,1], index: 0, kind: input, shape index: {}]   ;;  %s878_s1 = inlined_call_operand.vmem [shape: f32[8,1], index: 1, kind: input, shape index: {}]   ;;  %s879_s2 = inlined_call_operand.hbm [shape: f32[2,2048], index: 2, kind: input, shape index: {}]   ;;  %s880_s3 = inlined_call_operand.vmem [shape: f32[1,2048], index: 3, kind: input, shape index: {}]   ;;  %s881_s4 = inlined_call_operand.hbm [shape: f32[1,2048], index: 4, kind: input, shape index: {}]   ;;  %s882_s5 = inlined_call_operand.<no memory space> [shape: f32[1], index: 5, kind: input, shape index: {}]   ;;  %s883_s6 = inlined_call_operand.vmem [shape: f32[8,1], index: 6, kind: output, shape index: {}]  }
   0x1   :  { %13 = vsyncpa [#allocation6], 0  ;;  %s571_s21 = smov [#allocation3]   ;;  %s572_s23 = smov [#allocation5]  }
   0x2   :  { %s24_s22 = sshll.u32 %s571_s21, 4  ;;  %s36_s24 = sshll.u32 %s572_s23, 4  ;;  %s25_s22 = int_to_ptr.vmem [resolvable:$true] %s24_s22  ;;  %s37_s24 = int_to_ptr.vmem [resolvable:$true] %s36_s24 }
   0x3   :  { %s535_s25 = scalar_lea.vmem %s25_s22, 512  ;;  %p540_p1 = scmp.lt.s32.totalorder %s25_s22, %s25_s22 }
   0x4   :  { %p536_p0 = scmp.ne.s32.totalorder %s25_s22, %s535_s25  ;;  %p541_p2 = scmp.lt.s32.totalorder %s535_s25, %s535_s25 }
   0x6   :  { %p542_p3 = por %p541_p2, %p540_p1 }
   0x8   :  { %p543_p4 = pnand %p542_p3, %p536_p0 }
   0xa   :  { %546 = shalt.err (!%p543_p4)
}
   0xb   :  { %27 = dma.hbm_to_vmem [thread:$0]  %s879_s2, 512, %s25_s22, [#allocation4]  }
   0xc   :  { %s555_s28 = scalar_lea.vmem %s37_s24, 256  ;;  %p560_p6 = scmp.lt.s32.totalorder %s37_s24, %s37_s24 }
   0xd   :  { %p556_p5 = scmp.ne.s32.totalorder %s37_s24, %s555_s28  ;;  %p561_p7 = scmp.lt.s32.totalorder %s555_s28, %s555_s28 }
   0xf   :  { %p562_p8 = por %p561_p7, %p560_p6 }
  0x11   :  { %p563_p9 = pnand %p562_p8, %p556_p5 }
  0x13   :  { %566 = shalt.err (!%p563_p9)
}
  0x14   :  { %39 = dma.hbm_to_vmem [thread:$0]  %s881_s4, 256, %s37_s24, [#allocation6]  }
  0x15   :  { %567 = dma.done.wait [#allocation4], 512  }
  0x16   :  { %568 = vsyncadd [#allocation4], 4294966784 }
  0x17   :  { %569 = dma.done.wait [#allocation6], 256  }
  0x18   :  { %570 = vsyncadd [#allocation6], 4294967040  ;;  %v573_v0 = vmov 0   ;;  %v48_v1 = vld [vmem:[%s877_s0] sm:$0xff]  ;;  %v64_v3 = vlaneseq  ;;  %v643_v16 = vld [vmem:[#allocation3 + $0x10] ss:$2 sm:$0xff] }
  0x19   :  { %526 = vset.pattern.permute.xlu0 %v573_v0  ;;  %v49_v2 = vld [vmem:[%s878_s1] sm:$0xff]  ;;  %v692_v40 = vld [vmem:[#allocation3 + $0x11] ss:$2 sm:$0xff]  ;;  %vm515_vm0 = vcmask 7168  }
  0x1a   :  { %59 = vperm.xlu0 %526, %v48_v1   ;;  %v65_v4 = vshrl.u32 %v64_v3, 7  ;;  %v621_v5 = vld [vmem:[#allocation3 + $0x1] ss:$2 sm:$0xff]  ;;  %v629_v9 = vld [vmem:[#allocation3] ss:$2 sm:$0xff] }
  0x1b   :  { %v682_v35 = vld [vmem:[%s880_s3] sm:$0xff] }
  0x1c   :  { %v623_v6 = vsub.s32 0, %v65_v4  ;;  %v625_v7 = vsub.s32 1, %v65_v4  ;;  %v627_v8 = vsub.s32 2, %v65_v4  ;;  %v631_v10 = vsub.s32 3, %v65_v4 }
  0x1d   :  { %v633_v11 = vsub.s32 4, %v65_v4  ;;  %v635_v12 = vsub.s32 5, %v65_v4  ;;  %v637_v13 = vsub.s32 6, %v65_v4  ;;  %v641_v15 = vsub.s32 7, %v65_v4 }
  0x1e   :  { %162 = vperm.xlu0 %526, %v49_v2   ;;  %v170_v17 = vrot.slane %v621_v5, %v623_v6  ;;  %v174_v18 = vrot.slane %v621_v5, %v625_v7  ;;  %v67_v19 = vrot.slane %v629_v9, %v623_v6  ;;  %v71_v20 = vrot.slane %v629_v9, %v625_v7 }
  0x1f   :  { %v75_v21 = vrot.slane %v629_v9, %v627_v8  ;;  %v79_v22 = vrot.slane %v629_v9, %v631_v10  ;;  %v83_v23 = vrot.slane %v629_v9, %v633_v11  ;;  %v87_v24 = vrot.slane %v629_v9, %v635_v12 }
  0x20   :  { %v91_v25 = vrot.slane %v629_v9, %v637_v13  ;;  %v95_v27 = vrot.slane %v629_v9, %v641_v15  ;;  %v99_v28 = vrot.slane %v643_v16, %v623_v6  ;;  %v103_v29 = vrot.slane %v643_v16, %v625_v7 }
  0x21   :  { %v107_v30 = vrot.slane %v643_v16, %v627_v8  ;;  %v111_v31 = vrot.slane %v643_v16, %v631_v10  ;;  %v178_v32 = vrot.slane %v621_v5, %v627_v8  ;;  %v115_v36 = vrot.slane %v643_v16, %v633_v11 }
  0x22   :  { %v119_v37 = vrot.slane %v643_v16, %v635_v12  ;;  %v123_v38 = vrot.slane %v643_v16, %v637_v13  ;;  %v127_v39 = vrot.slane %v643_v16, %v641_v15  ;;  %v182_v43 = vrot.slane %v621_v5, %v631_v10 }
  0x23   :  { %v186_v44 = vrot.slane %v621_v5, %v633_v11  ;;  %v190_v45 = vrot.slane %v621_v5, %v635_v12  ;;  %v194_v46 = vrot.slane %v621_v5, %v637_v13  ;;  %v198_v47 = vrot.slane %v621_v5, %v641_v15  ;;  %v733_v5 = vld [vmem:[#allocation5] sm:$0xff] }
  0x24   :  { %v286_v48 = vrot.slane %v682_v35, %v623_v6  ;;  %v290_v52 = vrot.slane %v682_v35, %v625_v7  ;;  %v202_v53 = vrot.slane %v692_v40, %v623_v6  ;;  %v206_v54 = vrot.slane %v692_v40, %v625_v7 }
  0x25   :  { %v210_v55 = vrot.slane %v692_v40, %v627_v8  ;;  %v214_v56 = vrot.slane %v692_v40, %v631_v10  ;;  %v218_v58 = vrot.slane %v692_v40, %v633_v11  ;;  %v222_v59 = vrot.slane %v692_v40, %v635_v12 }
  0x26   :  { %v226_v62 = vrot.slane %v692_v40, %v637_v13  ;;  %v230_v63 = vrot.slane %v692_v40, %v641_v15  ;;  %v294_v0 = vrot.slane %v682_v35, %v627_v8 }
  0x95   :  { %v639_v14 = vpop.permute.xlu0 %59 }
  0x96   :  { %v144_v41 = vmul.f32 %v67_v19, %v639_v14  ;;  %v145_v42 = vmul.f32 %v71_v20, %v639_v14  ;;  %v146_v57 = vmul.f32 %v75_v21, %v639_v14  ;;  %v147_v61 = vmul.f32 %v79_v22, %v639_v14 }
  0x97   :  { %v306_v19 = vrot.slane %v682_v35, %v635_v12  ;;  %v310_v20 = vrot.slane %v682_v35, %v637_v13  ;;  %v148_v21 = vmul.f32 %v83_v23, %v639_v14  ;;  %v406_v23 = vrot.slane %v733_v5, %v625_v7 }
  0x99   :  { %v663_v26 = vpop.permute.xlu0 %162 }
  0x9a   :  { %v247_v33 = vmul.f32 %v170_v17, %v663_v26  ;;  %v248_v34 = vmul.f32 %v174_v18, %v663_v26  ;;  %v249_v49 = vmul.f32 %v178_v32, %v663_v26  ;;  %v250_v60 = vmul.f32 %v182_v43, %v663_v26 }
  0x9b   :  { %v251_v1 = vmul.f32 %v186_v44, %v663_v26  ;;  %v298_v17 = vrot.slane %v682_v35, %v631_v10  ;;  %v302_v18 = vrot.slane %v682_v35, %v633_v11  ;;  %v252_v22 = vmul.f32 %v190_v45, %v663_v26 }
  0x9c   :  { %v263_v50 = vadd.f32 %v247_v33, %v144_v41  ;;  %v264_v51 = vadd.f32 %v248_v34, %v145_v42  ;;  %v265_v2 = vadd.f32 %v249_v49, %v146_v57  ;;  %v266_v32 = vadd.f32 %v250_v60, %v147_v61  ;;  %v748_v33 = vld [vmem:[%s880_s3 + $0x8] sm:$0xff] }
  0x9d   :  { %v314_v34 = vrot.slane %v682_v35, %v641_v15  ;;  %v149_v41 = vmul.f32 %v87_v24, %v639_v14  ;;  %v253_v42 = vmul.f32 %v194_v46, %v663_v26  ;;  %v402_v43 = vrot.slane %v733_v5, %v623_v6 }
  0x9e   :  { %v363_v3 = vadd.f32 %v286_v48, %v263_v50  ;;  %v364_v4 = vadd.f32 %v290_v52, %v264_v51  ;;  %v267_v44 = vadd.f32 %v251_v1, %v148_v21  ;;  %v365_v45 = vadd.f32 %v294_v0, %v265_v2 }
  0x9f   :  { %v150_v50 = vmul.f32 %v91_v25, %v639_v14  ;;  %v318_v51 = vrot.slane %v748_v33, %v623_v6  ;;  %v322_v24 = vrot.slane %v748_v33, %v625_v7  ;;  %v326_v35 = vrot.slane %v748_v33, %v627_v8 }
  0xa0   :  { %v379_v48 = vmax.f32 %v363_v3, 0.0  ;;  %v380_v49 = vmax.f32 %v364_v4, 0.0  ;;  %v254_v46 = vmul.f32 %v198_v47, %v663_v26  ;;  %v268_v52 = vadd.f32 %v252_v22, %v149_v41 }
  0xa1   :  { %v330_v57 = vrot.slane %v748_v33, %v631_v10  ;;  %v366_v60 = vadd.f32 %v298_v17, %v266_v32  ;;  %v151_v25 = vmul.f32 %v95_v27, %v639_v14  ;;  %v255_v61 = vmul.f32 %v202_v53, %v663_v26 }
  0xa2   :  { %v269_v0 = vadd.f32 %v253_v42, %v150_v50  ;;  %v410_v1 = vrot.slane %v733_v5, %v627_v8  ;;  %v367_v2 = vadd.f32 %v302_v18, %v267_v44  ;;  %v381_v3 = vmax.f32 %v365_v45, 0.0 }
  0xa3   :  { %v479_v4 = vmul.f32 %v402_v43, %v379_v48  ;;  %v480_v47 = vmul.f32 %v406_v23, %v380_v49  ;;  %v152_v17 = vmul.f32 %v99_v28, %v639_v14  ;;  %v256_v21 = vmul.f32 %v206_v54, %v663_v26 }
  0xa4   :  { %v334_v9 = vrot.slane %v748_v33, %v633_v11  ;;  %v338_v27 = vrot.slane %v748_v33, %v635_v12  ;;  %v270_v53 = vadd.f32 %v254_v46, %v151_v25  ;;  %v368_v22 = vadd.f32 %v306_v19, %v268_v52 }
  0xa5   :  { %v382_v32 = vmax.f32 %v366_v60, 0.0  ;;  %v414_v18 = vrot.slane %v733_v5, %v631_v10  ;;  %v153_v41 = vmul.f32 %v103_v29, %v639_v14  ;;  %v257_v28 = vmul.f32 %v210_v55, %v663_v26 }
  0xa6   :  { %v271_v54 = vadd.f32 %v255_v61, %v152_v17  ;;  %v418_v42 = vrot.slane %v733_v5, %v633_v11  ;;  %v369_v43 = vadd.f32 %v310_v20, %v269_v0  ;;  %v383_v23 = vmax.f32 %v367_v2, 0.0 }
  0xa7   :  { %v481_v44 = vmul.f32 %v410_v1, %v381_v3  ;;  %v495_v45 = vadd.f32 %v480_v47, %v479_v4  ;;  %v154_v19 = vmul.f32 %v107_v30, %v639_v14  ;;  %v258_v29 = vmul.f32 %v214_v56, %v663_v26 }
  0xa8   :  { %v272_v48 = vadd.f32 %v256_v21, %v153_v41  ;;  %v422_v55 = vrot.slane %v733_v5, %v635_v12  ;;  %v370_v49 = vadd.f32 %v314_v34, %v270_v53  ;;  %v384_v50 = vmax.f32 %v368_v22, 0.0  ;;  %v813_v34 = vld [vmem:[#allocation5 + $0x8] sm:$0xff] }
  0xa9   :  { %v482_v20 = vmul.f32 %v414_v18, %v382_v32  ;;  %v496_v46 = vadd.f32 %v495_v45, %v481_v44  ;;  %v155_v52 = vmul.f32 %v111_v31, %v639_v14  ;;  %v259_v30 = vmul.f32 %v218_v58, %v663_v26 }
  0xaa   :  { %v273_v60 = vadd.f32 %v257_v28, %v154_v19  ;;  %v426_v56 = vrot.slane %v733_v5, %v637_v13  ;;  %v371_v25 = vadd.f32 %v318_v51, %v271_v54  ;;  %v385_v61 = vmax.f32 %v369_v43, 0.0 }
  0xab   :  { %v483_v0 = vmul.f32 %v418_v42, %v383_v23  ;;  %v497_v1 = vadd.f32 %v496_v46, %v482_v20  ;;  %v156_v31 = vmul.f32 %v115_v36, %v639_v14  ;;  %v260_v58 = vmul.f32 %v222_v59, %v663_v26 }
  0xac   :  { %v274_v2 = vadd.f32 %v258_v29, %v155_v52  ;;  %v430_v3 = vrot.slane %v733_v5, %v641_v15  ;;  %v372_v51 = vadd.f32 %v322_v24, %v272_v48  ;;  %v386_v4 = vmax.f32 %v370_v49, 0.0 }
  0xad   :  { %v484_v47 = vmul.f32 %v422_v55, %v384_v50  ;;  %v498_v17 = vadd.f32 %v497_v1, %v483_v0  ;;  %v157_v21 = vmul.f32 %v119_v37, %v639_v14  ;;  %v261_v36 = vmul.f32 %v226_v62, %v663_v26 }
  0xae   :  { %v275_v53 = vadd.f32 %v259_v30, %v156_v31  ;;  %v434_v59 = vrot.slane %v813_v34, %v623_v6  ;;  %v373_v22 = vadd.f32 %v326_v35, %v273_v60  ;;  %v387_v5 = vmax.f32 %v371_v25, 0.0 }
  0xaf   :  { %v485_v24 = vmul.f32 %v426_v56, %v385_v61  ;;  %v499_v32 = vadd.f32 %v498_v17, %v484_v47  ;;  %v158_v18 = vmul.f32 %v123_v38, %v639_v14  ;;  %v262_v37 = vmul.f32 %v230_v63, %v663_v26 }
  0xb0   :  { %v276_v41 = vadd.f32 %v260_v58, %v157_v21  ;;  %v438_v62 = vrot.slane %v813_v34, %v625_v7  ;;  %v374_v6 = vadd.f32 %v330_v57, %v274_v2  ;;  %v388_v35 = vmax.f32 %v372_v51, 0.0 }
  0xb1   :  { %v486_v28 = vmul.f32 %v430_v3, %v386_v4  ;;  %v500_v54 = vadd.f32 %v499_v32, %v485_v24  ;;  %v159_v38 = vmul.f32 %v127_v39, %v639_v14  ;;  %v277_v42 = vadd.f32 %v261_v36, %v158_v18 }
  0xb2   :  { %v342_v26 = vrot.slane %v748_v33, %v637_v13  ;;  %v442_v40 = vrot.slane %v813_v34, %v627_v8  ;;  %v375_v7 = vadd.f32 %v334_v9, %v275_v53  ;;  %v389_v63 = vmax.f32 %v373_v22, 0.0 }
  0xb3   :  { %v487_v43 = vmul.f32 %v434_v59, %v387_v5  ;;  %v501_v23 = vadd.f32 %v500_v54, %v486_v28  ;;  %v278_v57 = vadd.f32 %v262_v37, %v159_v38  ;;  %v346_v44 = vrot.slane %v748_v33, %v641_v15 }
  0xb4   :  { %v446_v45 = vrot.slane %v813_v34, %v631_v10  ;;  %v376_v14 = vadd.f32 %v338_v27, %v276_v41  ;;  %v390_v16 = vmax.f32 %v374_v6, 0.0  ;;  %v488_v39 = vmul.f32 %v438_v62, %v388_v35 }
  0xb5   :  { %v502_v19 = vadd.f32 %v501_v23, %v487_v43  ;;  %v450_v8 = vrot.slane %v813_v34, %v633_v11  ;;  %v377_v9 = vadd.f32 %v342_v26, %v277_v42  ;;  %v391_v29 = vmax.f32 %v375_v7, 0.0 }
  0xb6   :  { %v489_v48 = vmul.f32 %v442_v40, %v389_v63  ;;  %v454_v49 = vrot.slane %v813_v34, %v635_v12  ;;  %v378_v50 = vadd.f32 %v346_v44, %v278_v57  ;;  %v392_v20 = vmax.f32 %v376_v14, 0.0 }
  0xb7   :  { %v503_v55 = vadd.f32 %v502_v19, %v488_v39  ;;  %v490_v10 = vmul.f32 %v446_v45, %v390_v16  ;;  %v393_v52 = vmax.f32 %v377_v9, 0.0  ;;  %v458_v33 = vrot.slane %v813_v34, %v637_v13 }
  0xb8   :  { %v491_v27 = vmul.f32 %v450_v8, %v391_v29  ;;  %v394_v60 = vmax.f32 %v378_v50, 0.0  ;;  %v462_v11 = vrot.slane %v813_v34, %v641_v15  ;;  %v492_v56 = vmul.f32 %v454_v49, %v392_v20 }
  0xb9   :  { %v504_v46 = vadd.f32 %v503_v55, %v489_v48  ;;  %v493_v61 = vmul.f32 %v458_v33, %v393_v52  ;;  %v513_v58 = vstv %s882_s5 }
  0xba   :  { %v494_v1 = vmul.f32 %v462_v11, %v394_v60 }
  0xbb   :  { %v505_v30 = vadd.f32 %v504_v46, %v490_v10 }
  0xbd   :  { %v506_v25 = vadd.f32 %v505_v30, %v491_v27 }
  0xbf   :  { %v507_v0 = vadd.f32 %v506_v25, %v492_v56 }
  0xc1   :  { %v508_v12 = vadd.f32 %v507_v0, %v493_v61 }
  0xc3   :  { %v509_v31 = vadd.f32 %v508_v12, %v494_v1 }
  0xc5   :  { %510 = vadd.xlane.f32.xlu1 %v509_v31 }
 0x14e   :  { %v511_v13 = vpop.xlane.xlu1 %510 }
 0x14f   :  { %v514_v2 = vadd.f32 %v513_v58, %v511_v13 }
 0x151   :  { %516 = vst.msk [vmem:[%s883_s6] sm:$0xff] %vm515_vm0, %v514_v2 }
 0x152   :  { %521 = vsyncpa [#allocation4], 1 }
 0x153   :  { %522 = vsyncpa [#allocation6], 1 }

</bundles_post_ra>
